<compile_context>
chip_gen: v7x
topology: tpu7x:2x2x1
jax: 0.10.0
libtpu: 0.0.40
codegen_flags: <defaults>
</compile_context>

<pallas_src>
import jax
import jax.numpy as jnp
from jax.experimental import pallas as pl
from jax.experimental.pallas import tpu as pltpu


def _round_up(x, m):
    return (x + m - 1) // m * m


def _make_kernel(C_in, C_in_pad, C_out, K, L, padding, W_out):
    def conv1d_kernel(x_ref, w_ref, b_ref, o_ref, slab_ref):
        # x_ref:    (1, C_in, L)             one (unpadded) batch segment
        # w_ref:    (C_out, K * C_in_pad)    tap-major weight, zero-padded stripes
        # b_ref:    (C_out, 1)               bias column
        # o_ref:    (1, C_out, W_out)        lane-dense output block (W_out % 128 == 0)
        # slab_ref: (C_in_pad, W_out + K-1)  VMEM scratch: zero-padded input slab

        # 1) Zero-padded slab (one small aligned fill + the data overwrite).
        slab_ref[...] = jnp.zeros_like(slab_ref)
        slab_ref[:C_in, padding:padding + L] = x_ref[0]

        # 2) im2col: tap k is a statically offset lane window of the slab.
        #    Each tap is a full 8-sublane-aligned stripe, so the concat is just
        #    vreg stacking. (pltpu.roll on the XLU is an equivalent alternative
        #    when load slots become the bottleneck.)
        taps = [slab_ref[:, k:k + W_out] for k in range(K)]
        col = jnp.concatenate(taps, axis=0)  # (K * C_in_pad, W_out)

        # 3) One MXU matmul (f32 accumulation) + epilogue bias add (VPU);
        #    single unmasked lane-dense store.
        acc = jnp.dot(w_ref[...], col, preferred_element_type=jnp.float32)
        o_ref[0] = (acc + b_ref[...].astype(jnp.float32)).astype(o_ref.dtype)

    return conv1d_kernel


def causal_conv1d(x, weight, bias, padding):
    """Forward of nn.Conv1d(in_channels, out_channels, K, padding=padding).

    x: (N, C_in, L); weight: (C_out, C_in, K); bias: (C_out,).
    Returns (N, C_out, L + 2*padding - K + 1).  (Like the PyTorch module, the
    padding is symmetric — "causal" in name only.)
    """
    N, C_in, L = x.shape
    C_out, _, K = weight.shape
    L_pad = L + 2 * padding
    L_out = L_pad - K + 1
    assert L_out >= 1

    C_in_pad = _round_up(C_in, 8)        # sublane-aligned per-tap stripe height
    W_out = _round_up(L_pad, 128)        # lane-dense output width
    W_slab = W_out + K - 1               # tap windows [k, k+W_out) stay in-bounds

    # Tap-major 2-D weight with each tap's C_in padded to a full 8-row stripe;
    # cast to x.dtype so the MXU never sees mixed operand dtypes.
    w3 = jnp.transpose(weight, (0, 2, 1))                     # (C_out, K, C_in)
    w3 = jnp.pad(w3, ((0, 0), (0, 0), (0, C_in_pad - C_in)))  # zero padded rows
    w2d = w3.reshape(C_out, K * C_in_pad).astype(x.dtype)
    b2d = bias.reshape(C_out, 1).astype(x.dtype)

    kernel = _make_kernel(C_in, C_in_pad, C_out, K, L, padding, W_out)

    itemsize = jnp.dtype(x.dtype).itemsize
    cost = pl.CostEstimate(
        flops=2 * N * C_out * L_out * K * C_in,
        bytes_accessed=(x.size + w2d.size + b2d.size + N * C_out * W_out) * itemsize,
        transcendentals=0,
    )

    # TODO(synk): for long sequences, add an L-tile "parallel" grid axis with a
    # (K-1+2*padding) halo and DMA-direct slab fill; sized to v7x's 64 MiB VMEM.
    out = pl.pallas_call(
        kernel,
        out_shape=jax.ShapeDtypeStruct((N, C_out, W_out), x.dtype),
        grid_spec=pltpu.PrefetchScalarGridSpec(
            num_scalar_prefetch=0,
            grid=(N,),  # one batch segment per step; pipelined, megacore-parallel
            in_specs=[
                pl.BlockSpec((1, C_in, L), lambda n: (n, 0, 0)),
                pl.BlockSpec((C_out, K * C_in_pad), lambda n: (0, 0)),
                pl.BlockSpec((C_out, 1), lambda n: (0, 0)),
            ],
            out_specs=pl.BlockSpec((1, C_out, W_out), lambda n: (n, 0, 0)),
            scratch_shapes=[pltpu.VMEM((C_in_pad, W_slab), x.dtype)],
        ),
        compiler_params=pltpu.CompilerParams(
            dimension_semantics=("parallel",),
        ),
        cost_estimate=cost,
    )(x, w2d, b2d)

    # Output is already (N, C_out, ·): no transpose, just drop the lane padding.
    return out[:, :, :L_out]


if __name__ == "__main__":
    # Module hyperparameters (small, consistent with CausalConv1d.__init__)
    in_channels = 4
    out_channels = 8
    kernel_size = 3
    padding = 2  # typical "causal" padding = kernel_size - 1

    batch = 2
    seq_len = 16

    key = jax.random.PRNGKey(0)
    kx, kw, kb = jax.random.split(key, 3)

    # Deterministic synthetic parameters, nn.Conv1d shapes: (C_out, C_in, K), (C_out,)
    fan_in = in_channels * kernel_size
    bound = 1.0 / (fan_in ** 0.5)
    weight = jax.random.uniform(kw, (out_channels, in_channels, kernel_size),
                                jnp.float32, -bound, bound)
    bias = jax.random.uniform(kb, (out_channels,), jnp.float32, -bound, bound)
    x = jax.random.normal(kx, (batch, in_channels, seq_len), jnp.float32)

    out = causal_conv1d(x, weight, bias, padding)
    out = jax.block_until_ready(out)

    # Sanity-check against XLA's reference conv (not part of the kernel path).
    ref = jax.lax.conv_general_dilated(
        x, weight, window_strides=(1,), padding=[(padding, padding)],
        dimension_numbers=("NCH", "OIH", "NCH"),
    ) + bias.reshape(1, out_channels, 1)

    L_out = seq_len + 2 * padding - kernel_size + 1
    assert out.shape == (batch, out_channels, L_out)
    assert jnp.allclose(out, ref, atol=1e-4, rtol=1e-4), \
        float(jnp.max(jnp.abs(out - ref)))

    print("KERNEL_OK")
</pallas_src>

<mosaic_0001>
module attributes {stable_mosaic.version = 11 : i64} {
  func.func @conv1d_kernel(%arg0: i32, %arg1: memref<1x4x16xf32, #tpu.memory_space<vmem>>, %arg2: memref<8x24xf32, #tpu.memory_space<vmem>>, %arg3: memref<8x1xf32, #tpu.memory_space<vmem>>, %arg4: memref<1x8x128xf32, #tpu.memory_space<vmem>>, %arg5: memref<8x130xf32, #tpu.memory_space<vmem>>) attributes {dimension_semantics = [#tpu.dimension_semantics<parallel>], iteration_bounds = array<i64: 2>, scalar_prefetch = 0 : i64, scratch_operands = 1 : i64, tpu.core_type = #tpu.core_type<tc>, window_params = [{transform_indices = @transform_0, window_bounds = array<i64: 1, 4, 16>}, {pipeline_mode = #tpu.pipeline_mode<synchronous>, transform_indices = @transform_1, window_bounds = array<i64: 8, 24>}, {pipeline_mode = #tpu.pipeline_mode<synchronous>, transform_indices = @transform_2, window_bounds = array<i64: 8, 1>}, {transform_indices = @transform_3, window_bounds = array<i64: 1, 8, 128>}]} {
    %cst = arith.constant 0.000000e+00 : f32
    %0 = vector.broadcast %cst : f32 to vector<8x130xf32>
    %c0 = arith.constant 0 : index
    %c0_0 = arith.constant 0 : index
    %1 = vector.load %arg5[%c0, %c0_0] : memref<8x130xf32, #tpu.memory_space<vmem>>, vector<8x130xf32>
    tpu.vector_store %arg5[%c0, %c0_0], %0 {strides = array<i32>} : memref<8x130xf32, #tpu.memory_space<vmem>>, vector<8x130xf32>,
    %c0_1 = arith.constant 0 : index
    %c0_2 = arith.constant 0 : index
    %c0_3 = arith.constant 0 : index
    %2 = vector.load %arg1[%c0_1, %c0_2, %c0_3] : memref<1x4x16xf32, #tpu.memory_space<vmem>>, vector<1x4x16xf32>
    %3 = vector.shape_cast %2 : vector<1x4x16xf32> to vector<4x16xf32>
    %c0_4 = arith.constant 0 : index
    %c2 = arith.constant 2 : index
    %4 = vector.load %arg5[%c0_4, %c2] : memref<8x130xf32, #tpu.memory_space<vmem>>, vector<4x16xf32>
    tpu.vector_store %arg5[%c0_4, %c2], %3 {strides = array<i32>} : memref<8x130xf32, #tpu.memory_space<vmem>>, vector<4x16xf32>,
    %c0_5 = arith.constant 0 : index
    %c0_6 = arith.constant 0 : index
    %5 = vector.load %arg5[%c0_5, %c0_6] : memref<8x130xf32, #tpu.memory_space<vmem>>, vector<8x128xf32>
    %c0_7 = arith.constant 0 : index
    %c1 = arith.constant 1 : index
    %6 = vector.load %arg5[%c0_7, %c1] : memref<8x130xf32, #tpu.memory_space<vmem>>, vector<8x128xf32>
    %c0_8 = arith.constant 0 : index
    %c2_9 = arith.constant 2 : index
    %7 = vector.load %arg5[%c0_8, %c2_9] : memref<8x130xf32, #tpu.memory_space<vmem>>, vector<8x128xf32>
    %8 = tpu.concatenate %5, %6, %7 in 0 : vector<8x128xf32>, vector<8x128xf32>, vector<8x128xf32> -> vector<24x128xf32>
    %c0_10 = arith.constant 0 : index
    %c0_11 = arith.constant 0 : index
    %9 = vector.load %arg2[%c0_10, %c0_11] : memref<8x24xf32, #tpu.memory_space<vmem>>, vector<8x24xf32>
    %cst_12 = arith.constant dense<0.000000e+00> : vector<8x128xf32>
    %10 = tpu.matmul %9, %8, %cst_12 {dimension_numbers = #tpu.dot_dimension_numbers<[1], [0], [0], [1], [0, 0, 1, 1], [], []>} : vector<8x24xf32>, vector<24x128xf32>, vector<8x128xf32> -> vector<8x128xf32>
    %c0_13 = arith.constant 0 : index
    %c0_14 = arith.constant 0 : index
    %11 = vector.load %arg3[%c0_13, %c0_14] : memref<8x1xf32, #tpu.memory_space<vmem>>, vector<8x1xf32>
    %12 = vector.broadcast %11 : vector<8x1xf32> to vector<8x128xf32>
    %13 = arith.addf %10, %12 : vector<8x128xf32>
    %c0_15 = arith.constant 0 : index
    %c0_16 = arith.constant 0 : index
    %c0_17 = arith.constant 0 : index
    %14 = vector.load %arg4[%c0_15, %c0_16, %c0_17] : memref<1x8x128xf32, #tpu.memory_space<vmem>>, vector<1x8x128xf32>
    %15 = vector.shape_cast %14 : vector<1x8x128xf32> to vector<8x128xf32>
    %16 = vector.shape_cast %13 : vector<8x128xf32> to vector<1x8x128xf32>
    tpu.vector_store %arg4[%c0_15, %c0_16, %c0_17], %16 {strides = array<i32>} : memref<1x8x128xf32, #tpu.memory_space<vmem>>, vector<1x8x128xf32>,
    return
  }
  func.func @transform_0(%arg0: i32) -> (i32, i32, i32) {
    %c0_i32 = arith.constant 0 : i32
    %c0_i32_0 = arith.constant 0 : i32
    %c0_i32_1 = arith.constant 0 : i32
    return %arg0, %c0_i32, %c0_i32_0 : i32, i32, i32
  }
  func.func @transform_1(%arg0: i32) -> (i32, i32) {
    %c0_i32 = arith.constant 0 : i32
    %c0_i32_0 = arith.constant 0 : i32
    %c0_i32_1 = arith.constant 0 : i32
    return %c0_i32, %c0_i32_0 : i32, i32
  }
  func.func @transform_2(%arg0: i32) -> (i32, i32) {
    %c0_i32 = arith.constant 0 : i32
    %c0_i32_0 = arith.constant 0 : i32
    %c0_i32_1 = arith.constant 0 : i32
    return %c0_i32, %c0_i32_0 : i32, i32
  }
  func.func @transform_3(%arg0: i32) -> (i32, i32, i32) {
    %c0_i32 = arith.constant 0 : i32
    %c0_i32_0 = arith.constant 0 : i32
    %c0_i32_1 = arith.constant 0 : i32
    return %arg0, %c0_i32, %c0_i32_0 : i32, i32, i32
  }
}

</mosaic_0001>

<bundles_post_ra>
// kernel: tpu_custom_call.1
= control target key start
LH: loop header
LB: loop body
LE: loop exit
PB: predicated region body
PF: predicated region fallthrough
CT: control target
= control target key end

     0   :  { %8 = vsyncpa [#allocation4], 0  ;;  %s729_s0 = inlined_call_operand.vmem [shape: f32[2,4,16], index: 0, kind: input, shape index: {}]   ;;  %s730_s1 = inlined_call_operand.hbm [shape: f32[8,24], index: 1, kind: input, shape index: {}]   ;;  %s731_s2 = inlined_call_operand.vmem [shape: f32[8,1], index: 2, kind: input, shape index: {}]   ;;  %s732_s3 = inlined_call_operand.hbm [shape: f32[2,8,128], index: 3, kind: output, shape index: {}]  }
   0x1   :  { %9 = vsyncpa [#allocation5], 0 }
   0x2   :  { %11 = vsyncpa [#allocation5 + $0x1], 0  ;;  %s591_s12 = smov 0   ;;  %s593_s13 = smov 0  }
   0x3   :  { %s595_s14 = smov 0   ;;  %s597_s15 = smov 0  }
   0x4 LB: > { %s612_s16 = sadd.s32 4294967295, %s560_s15   ;;  %s374_s17 = sadd.s32 4294967294, %s560_s15   ;;  %s560_s15 = sphi %s597_s15, %s748_s15   ;;  %s556_s14 = sphi %s595_s14, %s747_s14   ;;  %s552_s13 = sphi %s593_s13, %s746_s13   ;;  %s548_s12 = sphi %s591_s12, %s745_s12  }
   0x5   : > { %s616_s18 = sadd.s32 1, %s560_s15   ;;  %s92_s19 = sadd.s32 1, %s556_s14 }
   0x6   : > { %s89_s20 = ssub.s32 %s560_s15, %s616_s18  ;;  %p102_p0 = scmp.ne.s32.totalorder %s556_s14, %s552_s13 }
   0x7   : > { %p90_p1 = scmp.eq.s32.totalorder %s89_s20, 0  ;;  %p103_p2 = scmp.eq.s32.totalorder %s612_s16, 1 }
   0x8   : > { %p108_p3 = scmp.ne.s32.totalorder %s552_s13, %s548_s12  ;;  %p109_p4 = scmp.eq.s32.totalorder %s374_s17, 1 }
   0x9   : > { %s627_s21 = scalar_select %p90_p1, %s556_s14, %s92_s19  }
   0xa   : > { %p629_p5 = por %p103_p2, %p102_p0  ;;  %p633_p6 = por %p109_p4, %p108_p3 }
   0xb   : > { %p375_p7 = scmp.ge.s32.totalorder %s560_s15, 1  ;;  %p116_p8 = scmp.lt.s32.totalorder %s560_s15, 3 }
   0xc   : > { %s736_s22 = scalar_select %p629_p5, 1, 0 }
   0xd   : > { %s737_s23 = scalar_select %p633_p6, 1, 0 }
   0xe   : > { %p733_p9 = scmp.eq.s32.totalorder %s612_s16, 0  ;;  %p640_p10 = pnand %p375_p7, %p116_p8 }
   0xf   : > { %s562_s25 = smov [#allocation3]   ;;  %s466_s30 = scalar_lea.hbm %s730_s1, 128 }
  0x10   : > { %s738_s24 = scalar_select %p640_p10, 1, 0 }
  0x11   : > { %s129_s26 = sshll.u32 %s562_s25, 4  ;;  %p409_p11 = pneg %p640_p10  ;;  %s130_s26 = int_to_ptr.vmem [resolvable:$true] %s129_s26 }
  0x12   : > { %p467_p13 = scmp.ne.s32.totalorder %s730_s1, %s466_s30  ;;  %p473_p3 = scmp.lt.u32.totalorder %s466_s30, %s730_s1 }
  0x13   : > { %p648_p12 = pnand %p733_p9, %p409_p11 }
  0x15   : > { %p468_p0 = pneg %p648_p12 }
  0x17   : > { %p469_p1 = pnand %p468_p0, %p467_p13 }
  0x19   : > { %p470_p2 = pneg %p469_p1 }
  0x1b   : > { %p475_p4 = pnand %p473_p3, %p470_p2 }
  0x1d   : > { %478 = shalt.err (!%p475_p4)
}
  0x1e   : > { %s479_s8 = scalar_lea.vmem %s130_s26, 128  ;;  %p487_p9 = scmp.lt.s32.totalorder %s130_s26, %s130_s26 }
  0x1f   : > { %p480_p7 = scmp.ne.s32.totalorder %s130_s26, %s479_s8  ;;  %p488_p6 = scmp.lt.s32.totalorder %s479_s8, %s479_s8 }
  0x21   : > { %p482_p8 = pnand %p480_p7, %p468_p0  ;;  %p489_p5 = por %p488_p6, %p487_p9 }
  0x23   : > { %p483_p11 = pneg %p482_p8 }
  0x25   : > { %p490_p10 = pnand %p489_p5, %p483_p11 }
  0x27   : > { %493 = shalt.err (!%p490_p10)
}
  0x28   : > { %412 = dma.hbm_to_vmem [thread:$0]  (!%p648_p12), %s730_s1, 128, %s130_s26, [#allocation4]  }
  0x29   : > { %p740_p13 = scmp.ne.s32.totalorder %s738_s24, 0 }
  0x2a   : > { %p741_p1 = scmp.eq.s32.totalorder (!%p740_p13), %s612_s16, 0 }
  0x2b   : > { %152 = sbr.rel (%p740_p13) target bundleno = 536 (0x218), region = 32 }
  0x32   : > { %539 = dma.done.wait (%p741_p1), [#allocation4], 128   ;;  %p742_p0 = pmov %p741_p1 }
  0x33   : > { %p175_p6 = scmp.lt.s32.totalorder %s612_s16, 1  ;;  %vm180_vm0 = vcmask 15360   ;;  %v563_v0 = vmov 0.0   ;;  %s564_s25 = smov 2   ;;  %vm187_vm1 = vcmask 142352   ;;  %v565_v3 = vmov 0.0|0.0  }
  0x34   : > { %541 = vsyncadd (%p742_p0), [#allocation4], 4294967168  ;;  %179 = vst [vmem:[#allocation2] sm:$0xff] %v563_v0  ;;  %400 = vmatprep.subr.bf16.mxu0 %v565_v3  ;;  %vm566_vm2 = vmmov 0   ;;  %s567_s26 = smov 126   ;;  %v568_v7 = vmov 0  }
  0x35   : > { %181 = vst.msk [vmem:[#allocation2 + $0x8] sm:$0xff] %vm180_vm0, %v563_v0  ;;  %s176_s11 = scalar_select %p175_p6, %s612_s16, 1  ;;  %397 = vmatprep.mubr.msk.f32.mxu0 %vm566_vm2, %v563_v0  ;;  %465 = vset.pattern.permute.xlu0 %v568_v7  ;;  %v208_v8 = vld [vmem:[%s731_s2] sm:$0xff]  ;;  %vm197_vm3 = vcmask 1039360   ;;  %vm204_vm4 = vcmask 1031168   ;;  %v207_v16 = vld [vmem:[#allocation3] sm:$0xff] }
  0x36   : > { %s569_s27 = smov 127   ;;  %vm214_vm5 = vcmask 195584   ;;  %s172_s30 = sand.u32 1, %s552_s13  }
  0x37   : > { %s381_s17 = sshll.u32 %s176_s11, 2  ;;  %s380_s4 = sshll.u32 %s172_s30, 3 }
  0x38   : > { %s178_s24 = scalar_lea.vmem %s729_s0, %s381_s17  ;;  %s384_s5 = sshll.u32 %s612_s16, 7 }
  0x39   : > { %v182_v1 = vld [vmem:[%s178_s24] sm:$0xf]  ;;  %s174_s6 = scalar_lea.vmem [#allocation6], %s380_s4  ;;  %s687_s10 = scalar_lea.hbm %s732_s3, %s384_s5 }
  0x3a   : > { %184 = vrot.lane.b32.xlu0 %v182_v1, %s564_s25  ;;  %s303_s7 = sshll.u32 %s174_s6, 4  ;;  %s290_s11 = scalar_lea.sflag [#allocation5], %s172_s30  ;;  %s689_s7 = int_to_ptr.vmem [resolvable:$true] %s303_s7 }
  0x3b   : > { %s494_s17 = scalar_lea.vmem %s689_s7, 128  ;;  %p743_p9 = scmp.ne.s32.totalorder %s736_s22, 0 }
  0x3c   : > { %v190_v4 = vld [vmem:[#allocation2 + $0x8] sm:$0xff]  ;;  %p495_p5 = scmp.ne.s32.totalorder %s689_s7, %s494_s17  ;;  %s570_s16 = smov [#allocation6]  }
  0x3d   : > { %s498_s19 = sshll.u32 %s570_s16, 4  ;;  %s499_s19 = int_to_ptr.vmem [resolvable:$false] %s498_s19 }
  0x3e   : > { %p496_p10 = pnand %p495_p5, %p743_p9  ;;  %s500_s20 = scalar_lea.vmem %s499_s19, 256 }
  0x3f   : > { %p501_p2 = scmp.lt.s32.totalorder %s689_s7, %s499_s19  ;;  %p502_p3 = scmp.lt.s32.totalorder %s500_s20, %s494_s17 }
  0x40   : > { %p497_p12 = pneg %p496_p10 }
  0x41   : > { %p503_p4 = por %p502_p3, %p501_p2 }
  0x43   : > { %p504_p7 = pnand %p503_p4, %p497_p12 }
  0xac   : > { %v185_v2 = vpop.permute.xlu0 %184 }
  0xad   : > { %188 = vst.msk [vmem:[#allocation2] sm:$0xf] %vm187_vm1, %v185_v2 }
  0xb4   : > { %v189_v5 = vld [vmem:[#allocation2] sm:$0xff] }
  0xb5   : > { %200 = vrot.lane.b32.xlu1 %v189_v5, %s567_s26  ;;  %v460_v6 = vpack.i.bf16 %v190_v4, %v189_v5 }
  0xb7   : > { %461 = vrot.lane.b32.xlu0 %v460_v6, %s569_s27 }
  0xb9   : > { %202 = vrot.lane.b32.xlu1 %v190_v4, %s567_s26 }
  0xbb   : > { %211 = vperm.xlu0 %465, %v208_v8  }
 0x127   : > { %v201_v9 = vpop.permute.xlu1 %200 }
 0x129   : > { %v462_v10 = vpop.permute.xlu0 %461 }
 0x12a   : > { %v464_v11 = vunpack.i.h.bf16 %v462_v10  ;;  %v463_v12 = vunpack.i.l.bf16 %v462_v10 }
 0x12b   : > { %v203_v15 = vpop.permute.xlu1 %202 }
 0x12c   : > { %v198_v13 = vsel %vm197_vm3, %v463_v12, %v464_v11  ;;  %v205_v17 = vsel %vm204_vm4, %v201_v9, %v203_v15 }
 0x12d   : > { %v401_v14 = vpack.c.bf16 %v198_v13, %v189_v5 }
 0x12f   : > { %402 = vmatpush3.bf16.msra.mxu0 %v401_v14 }
 0x130   : > { %395 = vmatprep.subr.mxu0 %v563_v0 }
 0x133   : > { %396 = vmatpush3.msra.mxu0 %v205_v17 }
 0x134   : > { %398 = vmatmul.mubr.msk.f32.vlgmr.msra.gmra.mrb[0].mxu0 %vm214_vm5, %v207_v16 }
 0x13a   : > { %v212_v18 = vpop.permute.xlu0 %211 }
 0x207   : > { %v284_v19 = vpop.f32.mrb[0].mxu0 }
 0x208   : > { %v285_v20 = vadd.f32 %v284_v19, %v212_v18  ;;  %v399_v21 = vpop.f32.mrb[1].mxu0 }
 0x20a   : > { %288 = vst [vmem:[%s174_s6] sm:$0xff] %v285_v20 }
 0x20b   : > { %507 = shalt.err (!%p504_p7)
}
 0x20c   : > { %s508_s24 = scalar_lea.hbm %s687_s10, 128  ;;  %s512_s27 = scalar_lea.hbm %s732_s3, 256 }
 0x20d   : > { %p509_p8 = scmp.ne.s32.totalorder %s687_s10, %s508_s24  ;;  %p513_p1 = scmp.lt.u32.totalorder %s687_s10, %s732_s3 }
 0x20e   : > { %p514_p0 = scmp.lt.u32.totalorder %s512_s27, %s508_s24  ;;  %p516_p5 = scmp.lt.u32.totalorder %s508_s24, %s687_s10 }
 0x20f   : > { %p510_p11 = pnand %p509_p8, %p743_p9 }
 0x210   : > { %p515_p6 = por %p514_p0, %p513_p1 }
 0x211   : > { %p511_p13 = pneg %p510_p11 }
 0x212   : > { %p517_p10 = por %p516_p5, %p515_p6 }
 0x214   : > { %p518_p12 = pnand %p517_p10, %p511_p13 }
 0x216   : > { %521 = shalt.err (!%p518_p12)
}
 0x217   : > { %407 = dma.vmem_to_hbm [thread:$0]  (%p743_p9), %s689_s7, 128, %s687_s10, %s290_s11  }
 0x218 PF: > { %p419_p2 = scmp.ge.s32.totalorder %s560_s15, 2  ;;  %s315_s30 = sand.u32 1, %s548_s12  }
 0x219   : > { %p744_p3 = scmp.ne.s32.totalorder %s737_s23, 0  ;;  %s316_s4 = scalar_lea.sflag [#allocation5], %s315_s30 }
 0x21b   : > { %p414_p4 = pnand %p419_p2, %p744_p3 }
 0x21d   : > { %543 = dma.done.wait (!%p414_p4), %s316_s4, 128  }
 0x21e   : > { %545 = vsyncadd (!%p414_p4), %s316_s4, 4294967168  ;;  %p14_p7 = scmp.ge.s32.totalorder %s616_s18, 4   ;;  %s745_s12 = smov %s552_s13 }
 0x21f   : > { %s746_s13 = smov %s556_s14  ;;  %s747_s14 = smov %s627_s21 }
 0x220   : > { %s748_s15 = smov %s616_s18  ;;  %16 = sbr.rel (!%p14_p7) target bundleno = 4 (0x4), region = 72 }
 0x227   :  { %321 = vsyncpa [#allocation4], 1 }
 0x228   :  { %323 = vsyncpa [#allocation4 + $0x1], 1 }
 0x229   :  { %324 = vsyncpa [#allocation5], 1 }
 0x22a   :  { %326 = vsyncpa [#allocation5 + $0x1], 1 }

</bundles_post_ra>
